<compile_context>
chip_gen: v6e
topology: v6e:2x2x1
jax: 0.10.0
libtpu: 0.0.40
codegen_flags: <defaults>
</compile_context>

<pallas_src>
import jax
import jax.numpy as jnp
from jax.experimental import pallas as pl
from jax.experimental.pallas import tpu as pltpu


def _add_pos_kernel(x_ref, pos_ref, o_ref):
    # x_ref / o_ref: (1, TH, W*D) strip of the input / output.
    # pos_ref:       (TH, W*D) matching strip of the positional table.
    o_ref[...] = x_ref[...] + pos_ref[...]


def learned_positional_encoding_2d(x, row_embed, col_embed):
    """x: (B, H*W, D); row_embed: (H, D/2); col_embed: (W, D/2)."""
    B, HW, D = x.shape
    H, d_half_r = row_embed.shape
    W, d_half_c = col_embed.shape
    assert D % 2 == 0 and d_half_r == d_half_c == D // 2
    assert HW == H * W

    # Precompute the full positional table once (tiny: H*W*D elements).  The
    # kernel then does zero redundant broadcast/concat work per grid step.
    pos = jnp.concatenate(
        [
            jnp.broadcast_to(row_embed[:, None, :], (H, W, D // 2)),
            jnp.broadcast_to(col_embed[None, :, :], (H, W, D // 2)),
        ],
        axis=-1,
    ).astype(x.dtype)                                   # (H, W, D)

    # Lane-dense layout: fold W and D into the last axis (contiguous reshape,
    # free) so stores are unmasked full-lane vst even when D < 128.
    WD = W * D
    x3 = x.reshape(B, H, WD)
    pos2 = pos.reshape(H, WD)

    # Row tile: target ~1 MiB per x block (mem-bound streaming add; big blocks
    # amortize per-step overhead, and ~1 MiB keeps double-buffered x + out +
    # pos comfortably under the default scoped VMEM on all generations,
    # including v7x's 64 MiB).
    row_bytes = WD * x.dtype.itemsize
    th = max(1, (1 << 20) // max(1, row_bytes))
    if th >= H:
        th = H                               # full axis extent: always legal
    else:
        th = max(8, (th // 8) * 8)           # keep sublane dim a multiple of 8
        th = min(th, H)

    grid = (B, pl.cdiv(H, th))

    out3 = pl.pallas_call(
        _add_pos_kernel,
        out_shape=jax.ShapeDtypeStruct((B, H, WD), x.dtype),
        grid_spec=pltpu.PrefetchScalarGridSpec(
            num_scalar_prefetch=0,
            grid=grid,
            in_specs=[
                # (1, TH, W*D) strip of x per grid point
                pl.BlockSpec((1, th, WD), lambda b, h: (b, h, 0)),
                # matching (TH, W*D) strip of pos, shared across the batch axis
                pl.BlockSpec((th, WD), lambda b, h: (h, 0)),
            ],
            out_specs=pl.BlockSpec((1, th, WD), lambda b, h: (b, h, 0)),
        ),
        compiler_params=pltpu.CompilerParams(
            dimension_semantics=("parallel", "parallel"),
        ),
    )(x3, pos2)

    # TODO(synk): training-mode dropout (p=0.1) not implemented; eval-mode
    # (identity) semantics are used, matching nn.Dropout in eval().
    return out3.reshape(B, HW, D)


if __name__ == "__main__":
    # Module config (small, consistent with the forward semantics)
    d_model, max_h, max_w = 32, 16, 16
    B = 2

    key = jax.random.PRNGKey(0)
    k_row, k_col, k_x = jax.random.split(key, 3)

    # Deterministic parameter init: normal(std=0.02), as in __init__.
    row_embed = 0.02 * jax.random.normal(k_row, (max_h, d_model // 2), jnp.float32)
    col_embed = 0.02 * jax.random.normal(k_col, (max_w, d_model // 2), jnp.float32)

    x = jax.random.normal(k_x, (B, max_h * max_w, d_model), jnp.float32)

    out = learned_positional_encoding_2d(x, row_embed, col_embed)
    out = jax.block_until_ready(out)

    # Pure-JAX reference (same as the PyTorch forward, eval-mode dropout)
    pos_ref = jnp.concatenate(
        [
            jnp.repeat(row_embed[:, None, :], max_w, axis=1),   # (H, W, D/2)
            jnp.repeat(col_embed[None, :, :], max_h, axis=0),   # (H, W, D/2)
        ],
        axis=-1,
    ).reshape(1, max_h * max_w, d_model)
    ref = x + pos_ref

    assert jnp.allclose(out, ref, atol=1e-6, rtol=1e-6), "mismatch vs reference"
    print("KERNEL_OK")
</pallas_src>

<mosaic_0001>
module attributes {stable_mosaic.version = 11 : i64} {
  func.func @_add_pos_kernel(%arg0: i32, %arg1: i32, %arg2: memref<1x16x512xf32, #tpu.memory_space<vmem>>, %arg3: memref<16x512xf32, #tpu.memory_space<vmem>>, %arg4: memref<1x16x512xf32, #tpu.memory_space<vmem>>) attributes {dimension_semantics = [#tpu.dimension_semantics<parallel>, #tpu.dimension_semantics<parallel>], iteration_bounds = array<i64: 2, 1>, scalar_prefetch = 0 : i64, scratch_operands = 0 : i64, tpu.core_type = #tpu.core_type<tc>, window_params = [{transform_indices = @transform_0, window_bounds = array<i64: 1, 16, 512>}, {transform_indices = @transform_1, window_bounds = array<i64: 16, 512>}, {transform_indices = @transform_2, window_bounds = array<i64: 1, 16, 512>}]} {
    %c0 = arith.constant 0 : index
    %c0_0 = arith.constant 0 : index
    %c0_1 = arith.constant 0 : index
    %0 = vector.load %arg2[%c0, %c0_0, %c0_1] : memref<1x16x512xf32, #tpu.memory_space<vmem>>, vector<1x16x512xf32>
    %c0_2 = arith.constant 0 : index
    %c0_3 = arith.constant 0 : index
    %1 = vector.load %arg3[%c0_2, %c0_3] : memref<16x512xf32, #tpu.memory_space<vmem>>, vector<16x512xf32>
    %2 = vector.shape_cast %1 : vector<16x512xf32> to vector<1x16x512xf32>
    %3 = arith.addf %0, %2 : vector<1x16x512xf32>
    %c0_4 = arith.constant 0 : index
    %c0_5 = arith.constant 0 : index
    %c0_6 = arith.constant 0 : index
    %4 = vector.load %arg4[%c0_4, %c0_5, %c0_6] : memref<1x16x512xf32, #tpu.memory_space<vmem>>, vector<1x16x512xf32>
    tpu.vector_store %arg4[%c0_4, %c0_5, %c0_6], %3 {strides = array<i32>} : memref<1x16x512xf32, #tpu.memory_space<vmem>>, vector<1x16x512xf32>,
    return
  }
  func.func @transform_0(%arg0: i32, %arg1: i32) -> (i32, i32, i32) {
    %c0_i32 = arith.constant 0 : i32
    %c0_i32_0 = arith.constant 0 : i32
    return %arg0, %arg1, %c0_i32 : i32, i32, i32
  }
  func.func @transform_1(%arg0: i32, %arg1: i32) -> (i32, i32) {
    %c0_i32 = arith.constant 0 : i32
    %c0_i32_0 = arith.constant 0 : i32
    return %arg1, %c0_i32 : i32, i32
  }
  func.func @transform_2(%arg0: i32, %arg1: i32) -> (i32, i32, i32) {
    %c0_i32 = arith.constant 0 : i32
    %c0_i32_0 = arith.constant 0 : i32
    return %arg0, %arg1, %c0_i32 : i32, i32, i32
  }
}

</mosaic_0001>

<bundles_post_ra>
// kernel: tpu_custom_call.1
= control target key start
LH: loop header
LB: loop body
LE: loop exit
PB: predicated region body
PF: predicated region fallthrough
CT: control target
= control target key end

     0   :  { %7 = vsyncpa [#allocation3], 0  ;;  %s811_s0 = inlined_call_operand.hbm [shape: f32[2,16,512], index: 0, kind: input, shape index: {}]   ;;  %s812_s1 = inlined_call_operand.hbm [shape: f32[16,512], index: 1, kind: input, shape index: {}]   ;;  %s813_s2 = inlined_call_operand.hbm [shape: f32[2,16,512], index: 2, kind: output, shape index: {}]  }
   0x1   :  { %9 = vsyncpa [#allocation3 + $0x1], 0 }
   0x2   :  { %10 = vsyncpa [#allocation6], 0 }
   0x3   :  { %11 = vsyncpa [#allocation4], 0 }
   0x4   :  { %13 = vsyncpa [#allocation4 + $0x1], 0  ;;  %s614_s9 = smov 0   ;;  %s616_s10 = smov 0  }
   0x5   :  { %s618_s11 = smov 0   ;;  %s620_s12 = smov 0  }
   0x6   :  { %s622_s13 = smov 0   ;;  %s624_s14 = smov 0  }
   0x7 LB: > { %s356_s15 = sadd.s32 4294967295, %s590_s14   ;;  %s357_s16 = sadd.s32 4294967294, %s590_s14   ;;  %s590_s14 = sphi %s624_s14, %s19_s14   ;;  %s586_s13 = sphi %s622_s13, %s833_s13   ;;  %s582_s12 = sphi %s620_s12, %s832_s12   ;;  %s578_s11 = sphi %s618_s11, %s831_s11   ;;  %s574_s10 = sphi %s616_s10, %s830_s10   ;;  %s570_s9 = sphi %s614_s9, %s829_s9  }
   0x8   : > { %p53_p0 = scmp.ne.s32.totalorder %s574_s10, %s570_s9  ;;  %p648_p1 = scmp.eq.s32.totalorder %s356_s15, 0 }
   0x9   : > { %p652_p2 = scmp.eq.s32.totalorder %s356_s15, 1  ;;  %p111_p3 = scmp.eq.s32.totalorder %s357_s16, 1 }
   0xa   : > { %p658_p4 = por %p648_p1, %p53_p0  ;;  %p358_p5 = scmp.ge.s32.totalorder %s590_s14, 1 }
   0xb   : > { %p663_p6 = por %p111_p3, %p53_p0  ;;  %p118_p7 = scmp.lt.s32.totalorder %s590_s14, 3 }
   0xc   : > { %s818_s19 = scalar_select %p658_p4, 1, 0 }
   0xd   : > { %s819_s20 = scalar_select %p663_p6, 1, 0 }
   0xe   : > { %p668_p8 = pnand %p358_p5, %p118_p7  ;;  %s592_s22 = smov [#allocation5]  }
   0xf   : > { %s134_s23 = sshll.u32 %s592_s22, 4  ;;  %s31_s25 = sadd.s32 1, %s586_s13  ;;  %s135_s23 = int_to_ptr.vmem [resolvable:$true] %s134_s23 }
  0x10   : > { %p383_p9 = pneg %p668_p8  ;;  %s463_s26 = scalar_lea.vmem %s135_s23, 1024 }
  0x11   : > { %p464_p13 = scmp.ne.s32.totalorder %s135_s23, %s463_s26  ;;  %p471_p5 = scmp.lt.s32.totalorder %s135_s23, %s135_s23 }
  0x12   : > { %p677_p11 = pnand %p383_p9, %p648_p1  ;;  %p472_p7 = scmp.lt.s32.totalorder %s463_s26, %s463_s26 }
  0x14   : > { %p454_p12 = pneg %p677_p11  ;;  %p473_p6 = por %p472_p7, %p471_p5 }
  0x16   : > { %p466_p0 = pnand %p464_p13, %p454_p12 }
  0x18   : > { %p467_p3 = pneg %p466_p0 }
  0x1a   : > { %p474_p4 = pnand %p473_p6, %p467_p3 }
  0x1c   : > { %477 = shalt.err (!%p474_p4)
}
  0x1d   : > { %s815_s27 = smov 512   ;;  %s594_s28 = smov 32  }
  0x1e   : > { %386 = dma.hbm_to_vmem [thread:$0]  (!%p677_p11), %s812_s1, 1024, %s135_s23, [#allocation6], %s815_s27, %s815_s27, %s594_s28  }
  0x1f   : > { %p33_p4 = scmp.ge.s32.totalorder %s31_s25, 2  ;;  %s40_s3 = sadd.s32 1, %s578_s11 }
  0x20   : > { %p47_p6 = scmp.ne.s32.totalorder %s578_s11, %s574_s10  ;;  %p48_p9 = scmp.eq.s32.totalorder %s590_s14, 0 }
  0x21   : > { %s835_s25 = smov (%p33_p4, %s31_s25), 0  ;;  %p396_p0 = scmp.lt.s32.totalorder %s590_s14, 2 }
  0x22   : > { %p698_p12 = por %p48_p9, %p47_p6  ;;  %p704_p13 = por %p652_p2, %p47_p6 }
  0x23   : > { %s35_s6 = ssub.s32 %s586_s13, %s835_s25  ;;  %s148_s7 = sand.u32 1, %s578_s11  }
  0x24   : > { %p38_p11 = scmp.eq.s32.totalorder %s35_s6, 0  ;;  %s361_s8 = sshll.u32 %s148_s7, 6 }
  0x25   : > { %s373_s16 = sshll.u32 %s586_s13, 10  ;;  %s152_s26 = scalar_lea.vmem [#allocation2], %s361_s8 }
  0x26   : > { %s713_s15 = scalar_select %p38_p11, %s578_s11, %s40_s3  }
  0x27   : > { %s161_s24 = scalar_lea.hbm %s811_s0, %s373_s16  ;;  %s162_s29 = sshll.u32 %s152_s26, 4  ;;  %s163_s29 = int_to_ptr.vmem [resolvable:$true] %s162_s29 }
  0x28   : > { %p721_p2 = pnand %p396_p0, %p698_p12  ;;  %s149_s30 = scalar_lea.sflag [#allocation3], %s148_s7 }
  0x29   : > { %s491_s6 = scalar_lea.vmem %s163_s29, 1024  ;;  %s595_s3 = smov [#allocation2]  }
  0x2a   : > { %p480_p3 = pneg %p721_p2  ;;  %p492_p5 = scmp.ne.s32.totalorder %s163_s29, %s491_s6 }
  0x2b   : > { %s496_s27 = sshll.u32 %s595_s3, 4  ;;  %s497_s27 = int_to_ptr.vmem [resolvable:$false] %s496_s27 }
  0x2c   : > { %p494_p7 = pnand %p492_p5, %p480_p3  ;;  %s498_s16 = scalar_lea.vmem %s497_s27, 2048 }
  0x2d   : > { %p499_p6 = scmp.lt.s32.totalorder %s163_s29, %s497_s27  ;;  %p500_p9 = scmp.lt.s32.totalorder %s498_s16, %s491_s6 }
  0x2e   : > { %p495_p4 = pneg %p494_p7 }
  0x2f   : > { %p501_p11 = por %p500_p9, %p499_p6 }
  0x31   : > { %p502_p10 = pnand %p501_p11, %p495_p4 }
  0x33   : > { %505 = shalt.err (!%p502_p10)
}
  0x34   : > { %s825_s4 = smov 512   ;;  %174 = sbr.rel (%p668_p8) target bundleno = 85 (0x55), region = 28 }
  0x35   : > { %390 = dma.hbm_to_vmem [thread:$0]  (!%p721_p2), %s161_s24, 1024, %s163_s29, %s149_s30, %s825_s4, %s825_s4, %s594_s28  }
  0x36   : > { %s735_s7 = sand.u32 (!%p668_p8), 1, %s574_s10   ;;  %p826_p10 = scmp.ne.s32.totalorder (!%p668_p8), %s818_s19, 0 }
  0x37   : > { %s365_s27 = sshll.u32 (!%p668_p8), %s735_s7, 6  ;;  %s177_s8 = scalar_lea.sflag (!%p668_p8), [#allocation3], %s735_s7 }
  0x38   : > { %s739_s22 = scalar_lea.vmem (!%p668_p8), [#allocation2], %s365_s27 }
  0x39   : > { %557 = dma.done.wait (%p826_p10), %s177_s8, 1024  }
  0x3a   : > { %559 = vsyncadd (%p826_p10), %s177_s8, 4294966272 }
  0x3b   : > { %561 = dma.done.wait (%p648_p1), [#allocation6], 1024  }
  0x3c   : > { %563 = vsyncadd (%p648_p1), [#allocation6], 4294966272  ;;  %v208_v0 = vld [vmem:[%s739_s22] sm:$0xff]  ;;  %v209_v2 = vld [vmem:[%s739_s22 + $0x8] sm:$0xff]  ;;  %s204_s19 = scalar_lea.vmem [#allocation7], %s365_s27  ;;  %s374_s17 = sshll.u32 %s582_s12, 10 }
  0x3d   : > { %v216_v1 = vld [vmem:[#allocation5] sm:$0xff]  ;;  %v217_v4 = vld [vmem:[#allocation5 + $0x8] sm:$0xff]  ;;  %v210_v5 = vld [vmem:[%s739_s22 + $0x10] sm:$0xff]  ;;  %s257_s21 = sshll.u32 %s204_s19, 4  ;;  %s763_s23 = scalar_lea.hbm %s813_s2, %s374_s17  ;;  %s758_s21 = int_to_ptr.vmem [resolvable:$true] %s257_s21 }
  0x3e   : > { %v224_v3 = vadd.f32 %v216_v1, %v208_v0  ;;  %v218_v6 = vld [vmem:[#allocation5 + $0x10] sm:$0xff]  ;;  %v225_v7 = vadd.f32 %v217_v4, %v209_v2  ;;  %v211_v9 = vld [vmem:[%s739_s22 + $0x18] sm:$0xff]  ;;  %v212_v11 = vld [vmem:[%s739_s22 + $0x20] sm:$0xff]  ;;  %s241_s24 = scalar_lea.sflag [#allocation4], %s735_s7  ;;  %s506_s26 = scalar_lea.vmem %s758_s21, 1024 }
  0x3f   : > { %v226_v8 = vadd.f32 %v218_v6, %v210_v5  ;;  %v219_v10 = vld [vmem:[#allocation5 + $0x18] sm:$0xff]  ;;  %v220_v13 = vld [vmem:[#allocation5 + $0x20] sm:$0xff]  ;;  %v213_v14 = vld [vmem:[%s739_s22 + $0x28] sm:$0xff]  ;;  %p507_p1 = scmp.ne.s32.totalorder %s758_s21, %s506_s26  ;;  %s596_s29 = smov [#allocation7]  }
  0x40   : > { %232 = vst [vmem:[%s204_s19] sm:$0xff] %v224_v3  ;;  %v227_v12 = vadd.f32 %v219_v10, %v211_v9  ;;  %v221_v15 = vld [vmem:[#allocation5 + $0x28] sm:$0xff]  ;;  %233 = vst [vmem:[%s204_s19 + $0x8] sm:$0xff] %v225_v7  ;;  %v228_v16 = vadd.f32 %v220_v13, %v212_v11  ;;  %v214_v18 = vld [vmem:[%s739_s22 + $0x30] sm:$0xff]  ;;  %s510_s18 = sshll.u32 %s596_s29, 4  ;;  %s511_s18 = int_to_ptr.vmem [resolvable:$false] %s510_s18 }
  0x41   : > { %234 = vst [vmem:[%s204_s19 + $0x10] sm:$0xff] %v226_v8  ;;  %v229_v17 = vadd.f32 %v221_v15, %v213_v14  ;;  %v222_v19 = vld [vmem:[#allocation5 + $0x30] sm:$0xff]  ;;  %v215_v20 = vld [vmem:[%s739_s22 + $0x38] sm:$0xff]  ;;  %p508_p8 = pnand %p507_p1, %p704_p13  ;;  %s512_s30 = scalar_lea.vmem %s511_s18, 2048 }
  0x42   : > { %235 = vst [vmem:[%s204_s19 + $0x18] sm:$0xff] %v227_v12  ;;  %v230_v21 = vadd.f32 %v222_v19, %v214_v18  ;;  %v223_v22 = vld [vmem:[#allocation5 + $0x38] sm:$0xff]  ;;  %236 = vst [vmem:[%s204_s19 + $0x20] sm:$0xff] %v228_v16  ;;  %p513_p0 = scmp.lt.s32.totalorder %s758_s21, %s511_s18  ;;  %p514_p2 = scmp.lt.s32.totalorder %s512_s30, %s506_s26 }
  0x43   : > { %237 = vst [vmem:[%s204_s19 + $0x28] sm:$0xff] %v229_v17  ;;  %v231_v23 = vadd.f32 %v223_v22, %v215_v20  ;;  %p509_p12 = pneg %p508_p8 }
  0x44   : > { %238 = vst [vmem:[%s204_s19 + $0x30] sm:$0xff] %v230_v21  ;;  %p515_p3 = por %p514_p2, %p513_p0 }
  0x45   : > { %239 = vst [vmem:[%s204_s19 + $0x38] sm:$0xff] %v231_v23 }
  0x46   : > { %p516_p5 = pnand %p515_p3, %p509_p12 }
  0x48   : > { %519 = shalt.err (!%p516_p5)
}
  0x49   : > { %s520_s6 = scalar_lea.hbm %s763_s23, 1024  ;;  %s524_s4 = scalar_lea.hbm %s813_s2, 2048 }
  0x4a   : > { %p521_p7 = scmp.ne.s32.totalorder %s763_s23, %s520_s6  ;;  %p525_p9 = scmp.lt.s32.totalorder %s763_s23, %s813_s2 }
  0x4b   : > { %p526_p11 = scmp.lt.s32.totalorder %s524_s4, %s520_s6 }
  0x4c   : > { %p522_p4 = pnand %p521_p7, %p704_p13 }
  0x4d   : > { %p527_p10 = por %p526_p11, %p525_p9 }
  0x4e   : > { %p523_p6 = pneg %p522_p4 }
  0x50   : > { %p528_p1 = pnand %p527_p10, %p523_p6 }
  0x52   : > { %531 = shalt.err (!%p528_p1)
}
  0x53   : > { %s597_s22 = smov 512   ;;  %s598_s19 = smov 32  }
  0x54   : > { %381 = dma.vmem_to_hbm [thread:$0]  (%p704_p13), %s758_s21, 1024, %s763_s23, %s241_s24, %s597_s22, %s597_s22, %s598_s19  }
  0x55 PF: > { %s272_s17 = sand.u32 1, %s570_s9   ;;  %p827_p8 = scmp.ne.s32.totalorder %s819_s20, 0 }
  0x56   : > { %p828_p12 = scmp.ge.s32.totalorder %s590_s14, 2  ;;  %s273_s12 = scalar_lea.sflag [#allocation4], %s272_s17 }
  0x58   : > { %p392_p0 = pnand %p828_p12, %p827_p8 }
  0x5a   : > { %p393_p2 = pneg %p392_p0 }
  0x5c   : > { %565 = dma.done.wait (%p393_p2), %s273_s12, 1024  }
  0x5d   : > { %567 = vsyncadd (%p393_p2), %s273_s12, 4294966272  ;;  %s19_s14 = sadd.s32 1, %s590_s14   ;;  %s829_s9 = smov %s574_s10 }
  0x5e   : > { %p16_p3 = scmp.ge.s32.totalorder %s19_s14, 4   ;;  %s830_s10 = smov %s578_s11 }
  0x5f   : > { %s831_s11 = smov %s713_s15  ;;  %s832_s12 = smov %s586_s13 }
  0x60   : > { %s833_s13 = smov %s835_s25  ;;  %18 = sbr.rel (!%p16_p3) target bundleno = 7 (0x7), region = 78 }
  0x65   :  { %278 = vsyncpa [#allocation3], 1 }
  0x66   :  { %280 = vsyncpa [#allocation3 + $0x1], 1 }
  0x67   :  { %281 = vsyncpa [#allocation6], 1 }
  0x68   :  { %282 = vsyncpa [#allocation4], 1 }
  0x69   :  { %284 = vsyncpa [#allocation4 + $0x1], 1 }

</bundles_post_ra>
